<compile_context>
chip_gen: v5e
topology: v5e:2x2
jax: 0.10.0
libtpu: 0.0.40
codegen_flags: <defaults>
</compile_context>

<pallas_src>
import jax
import jax.numpy as jnp
from jax.experimental import pallas as pl
from jax.experimental.pallas import tpu as pltpu

LN_EPS = 1e-5  # torch.nn.LayerNorm default


# --------------------------------------------------------------------------
# Small helpers
# --------------------------------------------------------------------------
def _round_up(n, m):
    return (n + m - 1) // m * m


def _block_vmem_bytes(shape, dtype):
    """Rough padded-VMEM footprint of one block buffer."""
    s = [int(d) for d in shape]
    if len(s) == 1:
        s = [1] + s
    s[-1] = _round_up(s[-1], 128)
    s[-2] = _round_up(s[-2], 8)
    n = 1
    for d in s:
        n *= d
    return n * jnp.dtype(dtype).itemsize


def _vmem_limit(blocks, scratch_blocks=()):
    """2x (double-buffer) all pipelined blocks + scratch + headroom."""
    total = 2 * sum(_block_vmem_bytes(s, d) for s, d in blocks)
    total += sum(_block_vmem_bytes(s, d) for s, d in scratch_blocks)
    limit = max(32 << 20, int(total * 1.25) + (2 << 20))
    return min(limit, 96 << 20)


def _layer_norm(v, g, b):
    mu = jnp.mean(v, axis=-1, keepdims=True)
    c = v - mu
    var = jnp.mean(c * c, axis=-1, keepdims=True)
    return c * jax.lax.rsqrt(var + LN_EPS) * g + b


def _erf(x):
    # Abramowitz & Stegun 7.1.26 (|abs err| < 1.5e-7); exp-only, Mosaic-safe.
    a1, a2, a3, a4, a5 = 0.254829592, -0.284496736, 1.421413741, -1.453152027, 1.061405429
    p = 0.3275911
    sgn = jnp.where(x >= 0.0, 1.0, -1.0)
    ax = jnp.abs(x)
    t = 1.0 / (1.0 + p * ax)
    poly = ((((a5 * t + a4) * t + a3) * t + a2) * t + a1) * t
    return sgn * (1.0 - poly * jnp.exp(-ax * ax))


def _gelu_exact(x):
    # torch.nn.GELU() default (exact erf form)
    return 0.5 * x * (1.0 + _erf(x * 0.7071067811865476))


# --------------------------------------------------------------------------
# Kernel 1: decoder layer stack (grid over layers, hidden state resident)
# --------------------------------------------------------------------------
def decoder_stack_kernel(
    # resident inputs (same block every grid step)
    x_ref, outln_ref,
    # per-layer streamed blocks (leading layer axis of size 1)
    vecs_ref, b1_ref, wv_ref, wo_ref, w1_ref, w2_ref,
    # output: final (output-LayerNormed) hidden state
    h_ref,
    # scratch
    x_acc,
):
    layer = pl.program_id(0)

    @pl.when(layer == 0)
    def _():
        x_acc[...] = x_ref[...].astype(jnp.float32)

    x = x_acc[...]                                   # (rows, E) f32

    vecs = vecs_ref[0]                               # (8, E) f32, packed vectors
    ln1_g, ln1_b = vecs[0:1, :], vecs[1:2, :]
    bv, bo = vecs[2:3, :], vecs[3:4, :]
    ln2_g, ln2_b = vecs[4:5, :], vecs[5:6, :]
    b2 = vecs[6:7, :]
    b1 = b1_ref[0]                                   # (1, H) f32

    # ---- self-attention branch: x + Attn(LN1(x)) ---------------------------
    # S == 1, no cache: softmax over a single key is identity, so the branch
    # reduces exactly to (LN1(x) @ Wv + bv) @ Wo + bo.  Dropout = identity.
    xn = _layer_norm(x, ln1_g, ln1_b)
    v = jnp.dot(xn.astype(jnp.bfloat16), wv_ref[0],
                preferred_element_type=jnp.float32) + bv
    attn = jnp.dot(v.astype(jnp.bfloat16), wo_ref[0],
                   preferred_element_type=jnp.float32) + bo
    x = x + attn

    # ---- feed-forward branch: x + FFN(LN2(x)) ------------------------------
    xn2 = _layer_norm(x, ln2_g, ln2_b)
    h1 = jnp.dot(xn2.astype(jnp.bfloat16), w1_ref[0],
                 preferred_element_type=jnp.float32) + b1
    h1 = _gelu_exact(h1)
    ff = jnp.dot(h1.astype(jnp.bfloat16), w2_ref[0],
                 preferred_element_type=jnp.float32) + b2
    x = x + ff

    x_acc[...] = x

    # ---- fused output LayerNorm on the last layer ---------------------------
    @pl.when(layer == pl.num_programs(0) - 1)
    def _():
        g = outln_ref[0:1, :]
        b = outln_ref[1:2, :]
        h_ref[...] = _layer_norm(x, g, b).astype(h_ref.dtype)


def decoder_stack_call(x2d, params):
    n_rows, e_dim = x2d.shape
    num_layers = params["wv"].shape[0]
    hidden = params["w1"].shape[-1]

    in_blocks = [
        ((n_rows, e_dim), jnp.float32),          # x (resident)
        ((8, e_dim), jnp.float32),               # out_ln (resident)
        ((1, 8, e_dim), jnp.float32),            # packed layer vectors
        ((1, 1, hidden), jnp.float32),           # b1
        ((1, e_dim, e_dim), jnp.bfloat16),       # wv
        ((1, e_dim, e_dim), jnp.bfloat16),       # wo
        ((1, e_dim, hidden), jnp.bfloat16),      # w1
        ((1, hidden, e_dim), jnp.bfloat16),      # w2
    ]
    out_block = ((n_rows, e_dim), jnp.float32)
    vmem_limit = _vmem_limit(in_blocks + [out_block],
                             scratch_blocks=[((n_rows, e_dim), jnp.float32)])

    in_specs = [
        pl.BlockSpec((n_rows, e_dim), lambda l: (0, 0)),
        pl.BlockSpec((8, e_dim), lambda l: (0, 0)),
        pl.BlockSpec((1, 8, e_dim), lambda l: (l, 0, 0)),
        pl.BlockSpec((1, 1, hidden), lambda l: (l, 0, 0)),
        pl.BlockSpec((1, e_dim, e_dim), lambda l: (l, 0, 0)),
        pl.BlockSpec((1, e_dim, e_dim), lambda l: (l, 0, 0)),
        pl.BlockSpec((1, e_dim, hidden), lambda l: (l, 0, 0)),
        pl.BlockSpec((1, hidden, e_dim), lambda l: (l, 0, 0)),
    ]

    return pl.pallas_call(
        decoder_stack_kernel,
        out_shape=jax.ShapeDtypeStruct((n_rows, e_dim), jnp.float32),
        grid_spec=pltpu.PrefetchScalarGridSpec(
            num_scalar_prefetch=0,
            grid=(num_layers,),
            in_specs=in_specs,
            out_specs=pl.BlockSpec((n_rows, e_dim), lambda l: (0, 0)),
            scratch_shapes=[pltpu.VMEM((n_rows, e_dim), jnp.float32)],
        ),
        compiler_params=pltpu.CompilerParams(
            dimension_semantics=("arbitrary",),    # layer axis carries x -> sequential
            vmem_limit_bytes=vmem_limit,
        ),
    )(x2d, params["out_ln"],
      params["layer_vecs"], params["b1"],
      params["wv"], params["wo"], params["w1"], params["w2"])


# --------------------------------------------------------------------------
# Kernel 2: lm_head, gridded over vocab tiles ("parallel" -> 2 TCs on v7x)
# --------------------------------------------------------------------------
def lm_head_kernel(h_ref, wlm_ref, blm_ref, logits_ref):
    logits = jnp.dot(h_ref[...].astype(jnp.bfloat16), wlm_ref[...],
                     preferred_element_type=jnp.float32) + blm_ref[...]
    logits_ref[...] = logits.astype(logits_ref.dtype)


def _pick_vocab_tile(vocab):
    for t in (1024, 512, 256, 128):
        if vocab % t == 0:
            return t
    return vocab


def lm_head_call(h, params):
    n_rows, e_dim = h.shape
    vocab = params["lm_w"].shape[-1]
    tile_v = _pick_vocab_tile(vocab)
    n_tiles = vocab // tile_v

    in_blocks = [
        ((n_rows, e_dim), jnp.float32),
        ((e_dim, tile_v), jnp.bfloat16),
        ((1, tile_v), jnp.float32),
    ]
    out_block = ((n_rows, tile_v), jnp.float32)
    vmem_limit = _vmem_limit(in_blocks + [out_block])

    return pl.pallas_call(
        lm_head_kernel,
        out_shape=jax.ShapeDtypeStruct((n_rows, vocab), jnp.float32),
        grid_spec=pltpu.PrefetchScalarGridSpec(
            num_scalar_prefetch=0,
            grid=(n_tiles,),
            in_specs=[
                pl.BlockSpec((n_rows, e_dim), lambda j: (0, 0)),
                pl.BlockSpec((e_dim, tile_v), lambda j: (0, j)),
                pl.BlockSpec((1, tile_v), lambda j: (0, j)),
            ],
            out_specs=pl.BlockSpec((n_rows, tile_v), lambda j: (0, j)),
        ),
        compiler_params=pltpu.CompilerParams(
            dimension_semantics=("parallel",),     # vocab tiles are independent
            vmem_limit_bytes=vmem_limit,
        ),
    )(h, params["lm_w"], params["lm_b"])


# --------------------------------------------------------------------------
# Parameter construction (deterministic, synthetic; stacked per layer)
# --------------------------------------------------------------------------
def init_params(key, vocab, e_dim, hidden, num_layers):
    ks = jax.random.split(key, 6)

    def lin(k, n, din, dout):
        # stored as (in, out) so the kernel computes x @ W (== x @ W_pt.T)
        w = jax.random.normal(k, (n, din, dout), jnp.float32) / jnp.sqrt(din)
        return w.astype(jnp.bfloat16)

    # Packed per-layer vectors, rows: [ln1_g, ln1_b, bv, bo, ln2_g, ln2_b, b2, pad]
    layer_vecs = jnp.zeros((num_layers, 8, e_dim), jnp.float32)
    layer_vecs = layer_vecs.at[:, 0, :].set(1.0)    # ln1 gamma
    layer_vecs = layer_vecs.at[:, 4, :].set(1.0)    # ln2 gamma
    # (biases rows 1,2,3,5,6 stay at PyTorch LayerNorm/Linear zero-ish defaults)

    out_ln = jnp.concatenate(
        [jnp.ones((1, e_dim), jnp.float32), jnp.zeros((7, e_dim), jnp.float32)], axis=0)

    params = {
        "embedding": jax.random.normal(ks[0], (vocab, e_dim), jnp.float32) * 0.02,
        "out_ln": out_ln,                                       # row0=gamma, row1=beta
        "lm_w": (jax.random.normal(ks[1], (e_dim, vocab), jnp.float32)
                 / jnp.sqrt(e_dim)).astype(jnp.bfloat16),
        "lm_b": jnp.zeros((1, vocab), jnp.float32),
        "layer_vecs": layer_vecs,
        "b1": jnp.zeros((num_layers, 1, hidden), jnp.float32),
        "wv": lin(ks[2], num_layers, e_dim, e_dim),
        "wo": lin(ks[3], num_layers, e_dim, e_dim),
        "w1": lin(ks[4], num_layers, e_dim, hidden),
        "w2": lin(ks[5], num_layers, hidden, e_dim),
        # NOTE: Wq/Wk (and rotary tables) omitted: with S == 1 and no KV cache
        # they provably do not affect the forward output.
    }
    return params


# --------------------------------------------------------------------------
# DecoderLM forward (glue: last-token slice + embedding gather in plain JAX)
# --------------------------------------------------------------------------
def decoder_lm_forward(tokens, params):
    B, seq_len = tokens.shape
    if seq_len > 1:                       # Decoder.forward keeps only the last token
        tokens = tokens[:, -1:]
    x2d = params["embedding"][tokens[:, 0]].astype(jnp.float32)   # (B, E)

    # Pad rows to a multiple of 8 for sublane-dense blocks; slice off after.
    n_pad = (-B) % 8
    if n_pad:
        x2d = jnp.pad(x2d, ((0, n_pad), (0, 0)))

    h = decoder_stack_call(x2d, params)        # (B_pad, E) f32, output-LayerNormed
    logits = lm_head_call(h, params)           # (B_pad, V) f32
    return logits[:B].reshape(B, 1, -1)


if __name__ == "__main__":
    # ModelArgs-equivalent small config
    VOCAB, NUM_LAYERS, EMBED_DIM, HIDDEN, NUM_HEADS = 32, 2, 32, 64, 4
    B, SEQ = 2, 8

    key = jax.random.PRNGKey(0)
    k_params, k_tok = jax.random.split(key)
    params = init_params(k_params, VOCAB, EMBED_DIM, HIDDEN, NUM_LAYERS)
    tokens = jax.random.randint(k_tok, (B, SEQ), 0, VOCAB, dtype=jnp.int32)

    logits = decoder_lm_forward(tokens, params)
    logits = jax.block_until_ready(logits)
    assert logits.shape == (B, 1, VOCAB)
    assert bool(jnp.all(jnp.isfinite(logits)))
    print("KERNEL_OK")
</pallas_src>

<mosaic_0001>
module attributes {stable_mosaic.version = 11 : i64} {
  func.func @decoder_stack_kernel(%arg0: i32, %arg1: memref<8x32xf32, #tpu.memory_space<vmem>>, %arg2: memref<8x32xf32, #tpu.memory_space<vmem>>, %arg3: memref<1x8x32xf32, #tpu.memory_space<vmem>>, %arg4: memref<1x1x64xf32, #tpu.memory_space<vmem>>, %arg5: memref<1x32x32xbf16, #tpu.memory_space<vmem>>, %arg6: memref<1x32x32xbf16, #tpu.memory_space<vmem>>, %arg7: memref<1x32x64xbf16, #tpu.memory_space<vmem>>, %arg8: memref<1x64x32xbf16, #tpu.memory_space<vmem>>, %arg9: memref<8x32xf32, #tpu.memory_space<vmem>>, %arg10: memref<8x32xf32, #tpu.memory_space<vmem>>) attributes {dimension_semantics = [#tpu.dimension_semantics<arbitrary>], iteration_bounds = array<i64: 2>, scalar_prefetch = 0 : i64, scratch_operands = 1 : i64, tpu.core_type = #tpu.core_type<tc>, window_params = [{pipeline_mode = #tpu.pipeline_mode<synchronous>, transform_indices = @transform_0, window_bounds = array<i64: 8, 32>}, {pipeline_mode = #tpu.pipeline_mode<synchronous>, transform_indices = @transform_1, window_bounds = array<i64: 8, 32>}, {transform_indices = @transform_2, window_bounds = array<i64: 1, 8, 32>}, {transform_indices = @transform_3, window_bounds = array<i64: 1, 1, 64>}, {transform_indices = @transform_4, window_bounds = array<i64: 1, 32, 32>}, {transform_indices = @transform_5, window_bounds = array<i64: 1, 32, 32>}, {transform_indices = @transform_6, window_bounds = array<i64: 1, 32, 64>}, {transform_indices = @transform_7, window_bounds = array<i64: 1, 64, 32>}, {pipeline_mode = #tpu.pipeline_mode<synchronous>, transform_indices = @transform_8, window_bounds = array<i64: 8, 32>}]} {
    %c0_i32 = arith.constant 0 : i32
    %0 = arith.cmpi eq, %arg0, %c0_i32 : i32
    %1 = arith.extui %0 : i1 to i32
    %c0_i32_0 = arith.constant 0 : i32
    %2 = arith.cmpi ne, %1, %c0_i32_0 : i32
    scf.if %2 {
      %c0_52 = arith.constant 0 : index
      %c0_53 = arith.constant 0 : index
      %126 = vector.load %arg1[%c0_52, %c0_53] : memref<8x32xf32, #tpu.memory_space<vmem>>, vector<8x32xf32>
      %c0_54 = arith.constant 0 : index
      %c0_55 = arith.constant 0 : index
      %127 = vector.load %arg10[%c0_54, %c0_55] : memref<8x32xf32, #tpu.memory_space<vmem>>, vector<8x32xf32>
      tpu.vector_store %arg10[%c0_54, %c0_55], %126 {strides = array<i32>} : memref<8x32xf32, #tpu.memory_space<vmem>>, vector<8x32xf32>,
    } else {
    }
    %c0 = arith.constant 0 : index
    %c0_1 = arith.constant 0 : index
    %3 = vector.load %arg10[%c0, %c0_1] : memref<8x32xf32, #tpu.memory_space<vmem>>, vector<8x32xf32>
    %c0_2 = arith.constant 0 : index
    %c0_3 = arith.constant 0 : index
    %c0_4 = arith.constant 0 : index
    %4 = vector.load %arg3[%c0_2, %c0_3, %c0_4] : memref<1x8x32xf32, #tpu.memory_space<vmem>>, vector<1x8x32xf32>
    %5 = vector.shape_cast %4 : vector<1x8x32xf32> to vector<8x32xf32>
    %6 = vector.extract_strided_slice %5 {offsets = [0, 0], sizes = [1, 32], strides = [1, 1]} : vector<8x32xf32> to vector<1x32xf32>
    %7 = vector.extract_strided_slice %5 {offsets = [1, 0], sizes = [1, 32], strides = [1, 1]} : vector<8x32xf32> to vector<1x32xf32>
    %8 = vector.extract_strided_slice %5 {offsets = [2, 0], sizes = [1, 32], strides = [1, 1]} : vector<8x32xf32> to vector<1x32xf32>
    %9 = vector.extract_strided_slice %5 {offsets = [3, 0], sizes = [1, 32], strides = [1, 1]} : vector<8x32xf32> to vector<1x32xf32>
    %10 = vector.extract_strided_slice %5 {offsets = [4, 0], sizes = [1, 32], strides = [1, 1]} : vector<8x32xf32> to vector<1x32xf32>
    %11 = vector.extract_strided_slice %5 {offsets = [5, 0], sizes = [1, 32], strides = [1, 1]} : vector<8x32xf32> to vector<1x32xf32>
    %12 = vector.extract_strided_slice %5 {offsets = [6, 0], sizes = [1, 32], strides = [1, 1]} : vector<8x32xf32> to vector<1x32xf32>
    %c0_5 = arith.constant 0 : index
    %c0_6 = arith.constant 0 : index
    %c0_7 = arith.constant 0 : index
    %13 = vector.load %arg4[%c0_5, %c0_6, %c0_7] : memref<1x1x64xf32, #tpu.memory_space<vmem>>, vector<1x1x64xf32>
    %14 = vector.shape_cast %13 : vector<1x1x64xf32> to vector<1x64xf32>
    %cst = arith.constant dense<0.000000e+00> : vector<8xf32>
    %15 = vector.multi_reduction <add>, %3, %cst [1] : vector<8x32xf32> to vector<8xf32>
    %16 = vector.shape_cast %15 : vector<8xf32> to vector<8x1xf32>
    %cst_8 = arith.constant 3.200000e+01 : f32
    %17 = vector.broadcast %cst_8 : f32 to vector<8x1xf32>
    %18 = arith.divf %16, %17 : vector<8x1xf32>
    %19 = vector.broadcast %18 : vector<8x1xf32> to vector<8x32xf32>
    %20 = arith.subf %3, %19 : vector<8x32xf32>
    %21 = arith.mulf %20, %20 : vector<8x32xf32>
    %cst_9 = arith.constant dense<0.000000e+00> : vector<8xf32>
    %22 = vector.multi_reduction <add>, %21, %cst_9 [1] : vector<8x32xf32> to vector<8xf32>
    %23 = vector.shape_cast %22 : vector<8xf32> to vector<8x1xf32>
    %cst_10 = arith.constant 3.200000e+01 : f32
    %24 = vector.broadcast %cst_10 : f32 to vector<8x1xf32>
    %25 = arith.divf %23, %24 : vector<8x1xf32>
    %cst_11 = arith.constant 9.99999974E-6 : f32
    %26 = vector.broadcast %cst_11 : f32 to vector<8x1xf32>
    %27 = arith.addf %25, %26 : vector<8x1xf32>
    %28 = math.rsqrt %27 : vector<8x1xf32>
    %29 = vector.broadcast %28 : vector<8x1xf32> to vector<8x32xf32>
    %30 = arith.mulf %20, %29 : vector<8x32xf32>
    %31 = vector.broadcast %6 : vector<1x32xf32> to vector<8x32xf32>
    %32 = arith.mulf %30, %31 : vector<8x32xf32>
    %33 = vector.broadcast %7 : vector<1x32xf32> to vector<8x32xf32>
    %34 = arith.addf %32, %33 : vector<8x32xf32>
    %35 = arith.truncf %34 : vector<8x32xf32> to vector<8x32xbf16>
    %c0_12 = arith.constant 0 : index
    %c0_13 = arith.constant 0 : index
    %c0_14 = arith.constant 0 : index
    %36 = vector.load %arg5[%c0_12, %c0_13, %c0_14] : memref<1x32x32xbf16, #tpu.memory_space<vmem>>, vector<1x32x32xbf16>
    %37 = vector.shape_cast %36 : vector<1x32x32xbf16> to vector<32x32xbf16>
    %cst_15 = arith.constant dense<0.000000e+00> : vector<8x32xf32>
    %38 = tpu.matmul %35, %37, %cst_15 {dimension_numbers = #tpu.dot_dimension_numbers<[1], [0], [0], [1], [0, 0, 1, 1], [], []>} : vector<8x32xbf16>, vector<32x32xbf16>, vector<8x32xf32> -> vector<8x32xf32>
    %39 = vector.broadcast %8 : vector<1x32xf32> to vector<8x32xf32>
    %40 = arith.addf %38, %39 : vector<8x32xf32>
    %41 = arith.truncf %40 : vector<8x32xf32> to vector<8x32xbf16>
    %c0_16 = arith.constant 0 : index
    %c0_17 = arith.constant 0 : index
    %c0_18 = arith.constant 0 : index
    %42 = vector.load %arg6[%c0_16, %c0_17, %c0_18] : memref<1x32x32xbf16, #tpu.memory_space<vmem>>, vector<1x32x32xbf16>
    %43 = vector.shape_cast %42 : vector<1x32x32xbf16> to vector<32x32xbf16>
    %cst_19 = arith.constant dense<0.000000e+00> : vector<8x32xf32>
    %44 = tpu.matmul %41, %43, %cst_19 {dimension_numbers = #tpu.dot_dimension_numbers<[1], [0], [0], [1], [0, 0, 1, 1], [], []>} : vector<8x32xbf16>, vector<32x32xbf16>, vector<8x32xf32> -> vector<8x32xf32>
    %45 = vector.broadcast %9 : vector<1x32xf32> to vector<8x32xf32>
    %46 = arith.addf %44, %45 : vector<8x32xf32>
    %47 = arith.addf %3, %46 : vector<8x32xf32>
    %cst_20 = arith.constant dense<0.000000e+00> : vector<8xf32>
    %48 = vector.multi_reduction <add>, %47, %cst_20 [1] : vector<8x32xf32> to vector<8xf32>
    %49 = vector.shape_cast %48 : vector<8xf32> to vector<8x1xf32>
    %cst_21 = arith.constant 3.200000e+01 : f32
    %50 = vector.broadcast %cst_21 : f32 to vector<8x1xf32>
    %51 = arith.divf %49, %50 : vector<8x1xf32>
    %52 = vector.broadcast %51 : vector<8x1xf32> to vector<8x32xf32>
    %53 = arith.subf %47, %52 : vector<8x32xf32>
    %54 = arith.mulf %53, %53 : vector<8x32xf32>
    %cst_22 = arith.constant dense<0.000000e+00> : vector<8xf32>
    %55 = vector.multi_reduction <add>, %54, %cst_22 [1] : vector<8x32xf32> to vector<8xf32>
    %56 = vector.shape_cast %55 : vector<8xf32> to vector<8x1xf32>
    %cst_23 = arith.constant 3.200000e+01 : f32
    %57 = vector.broadcast %cst_23 : f32 to vector<8x1xf32>
    %58 = arith.divf %56, %57 : vector<8x1xf32>
    %cst_24 = arith.constant 9.99999974E-6 : f32
    %59 = vector.broadcast %cst_24 : f32 to vector<8x1xf32>
    %60 = arith.addf %58, %59 : vector<8x1xf32>
    %61 = math.rsqrt %60 : vector<8x1xf32>
    %62 = vector.broadcast %61 : vector<8x1xf32> to vector<8x32xf32>
    %63 = arith.mulf %53, %62 : vector<8x32xf32>
    %64 = vector.broadcast %10 : vector<1x32xf32> to vector<8x32xf32>
    %65 = arith.mulf %63, %64 : vector<8x32xf32>
    %66 = vector.broadcast %11 : vector<1x32xf32> to vector<8x32xf32>
    %67 = arith.addf %65, %66 : vector<8x32xf32>
    %68 = arith.truncf %67 : vector<8x32xf32> to vector<8x32xbf16>
    %c0_25 = arith.constant 0 : index
    %c0_26 = arith.constant 0 : index
    %c0_27 = arith.constant 0 : index
    %69 = vector.load %arg7[%c0_25, %c0_26, %c0_27] : memref<1x32x64xbf16, #tpu.memory_space<vmem>>, vector<1x32x64xbf16>
    %70 = vector.shape_cast %69 : vector<1x32x64xbf16> to vector<32x64xbf16>
    %cst_28 = arith.constant dense<0.000000e+00> : vector<8x64xf32>
    %71 = tpu.matmul %68, %70, %cst_28 {dimension_numbers = #tpu.dot_dimension_numbers<[1], [0], [0], [1], [0, 0, 1, 1], [], []>} : vector<8x32xbf16>, vector<32x64xbf16>, vector<8x64xf32> -> vector<8x64xf32>
    %72 = vector.broadcast %14 : vector<1x64xf32> to vector<8x64xf32>
    %73 = arith.addf %71, %72 : vector<8x64xf32>
    %cst_29 = arith.constant 5.000000e-01 : f32
    %74 = vector.broadcast %cst_29 : f32 to vector<8x64xf32>
    %75 = arith.mulf %74, %73 : vector<8x64xf32>
    %cst_30 = arith.constant 0.707106769 : f32
    %76 = vector.broadcast %cst_30 : f32 to vector<8x64xf32>
    %77 = arith.mulf %73, %76 : vector<8x64xf32>
    %cst_31 = arith.constant 0.000000e+00 : f32
    %78 = vector.broadcast %cst_31 : f32 to vector<8x64xf32>
    %79 = arith.cmpf oge, %77, %78 : vector<8x64xf32>
    %cst_32 = arith.constant 1.000000e+00 : f32
    %cst_33 = arith.constant -1.000000e+00 : f32
    %80 = vector.broadcast %cst_32 : f32 to vector<8x64xf32>
    %81 = vector.broadcast %cst_33 : f32 to vector<8x64xf32>
    %82 = arith.select %79, %80, %81 : vector<8x64xi1>, vector<8x64xf32>
    %83 = math.absf %77 : vector<8x64xf32>
    %cst_34 = arith.constant 0.327591091 : f32
    %84 = vector.broadcast %cst_34 : f32 to vector<8x64xf32>
    %85 = arith.mulf %84, %83 : vector<8x64xf32>
    %cst_35 = arith.constant 1.000000e+00 : f32
    %86 = vector.broadcast %cst_35 : f32 to vector<8x64xf32>
    %87 = arith.addf %86, %85 : vector<8x64xf32>
    %cst_36 = arith.constant 1.000000e+00 : f32
    %88 = vector.broadcast %cst_36 : f32 to vector<8x64xf32>
    %89 = arith.divf %88, %87 : vector<8x64xf32>
    %cst_37 = arith.constant 1.06140542 : f32
    %90 = vector.broadcast %cst_37 : f32 to vector<8x64xf32>
    %91 = arith.mulf %90, %89 : vector<8x64xf32>
    %cst_38 = arith.constant -1.45315206 : f32
    %92 = vector.broadcast %cst_38 : f32 to vector<8x64xf32>
    %93 = arith.addf %91, %92 : vector<8x64xf32>
    %94 = arith.mulf %93, %89 : vector<8x64xf32>
    %cst_39 = arith.constant 1.42141378 : f32
    %95 = vector.broadcast %cst_39 : f32 to vector<8x64xf32>
    %96 = arith.addf %94, %95 : vector<8x64xf32>
    %97 = arith.mulf %96, %89 : vector<8x64xf32>
    %cst_40 = arith.constant -0.284496725 : f32
    %98 = vector.broadcast %cst_40 : f32 to vector<8x64xf32>
    %99 = arith.addf %97, %98 : vector<8x64xf32>
    %100 = arith.mulf %99, %89 : vector<8x64xf32>
    %cst_41 = arith.constant 0.254829586 : f32
    %101 = vector.broadcast %cst_41 : f32 to vector<8x64xf32>
    %102 = arith.addf %100, %101 : vector<8x64xf32>
    %103 = arith.mulf %102, %89 : vector<8x64xf32>
    %cst_42 = arith.constant 0.000000e+00 : f32
    %104 = vector.broadcast %cst_42 : f32 to vector<8x64xf32>
    %105 = arith.subf %104, %83 : vector<8x64xf32>
    %106 = arith.mulf %105, %83 : vector<8x64xf32>
    %107 = math.exp %106 : vector<8x64xf32>
    %108 = arith.mulf %103, %107 : vector<8x64xf32>
    %cst_43 = arith.constant 1.000000e+00 : f32
    %109 = vector.broadcast %cst_43 : f32 to vector<8x64xf32>
    %110 = arith.subf %109, %108 : vector<8x64xf32>
    %111 = arith.mulf %82, %110 : vector<8x64xf32>
    %cst_44 = arith.constant 1.000000e+00 : f32
    %112 = vector.broadcast %cst_44 : f32 to vector<8x64xf32>
    %113 = arith.addf %112, %111 : vector<8x64xf32>
    %114 = arith.mulf %75, %113 : vector<8x64xf32>
    %115 = arith.truncf %114 : vector<8x64xf32> to vector<8x64xbf16>
    %c0_45 = arith.constant 0 : index
    %c0_46 = arith.constant 0 : index
    %c0_47 = arith.constant 0 : index
    %116 = vector.load %arg8[%c0_45, %c0_46, %c0_47] : memref<1x64x32xbf16, #tpu.memory_space<vmem>>, vector<1x64x32xbf16>
    %117 = vector.shape_cast %116 : vector<1x64x32xbf16> to vector<64x32xbf16>
    %cst_48 = arith.constant dense<0.000000e+00> : vector<8x32xf32>
    %118 = tpu.matmul %115, %117, %cst_48 {dimension_numbers = #tpu.dot_dimension_numbers<[1], [0], [0], [1], [0, 0, 1, 1], [], []>} : vector<8x64xbf16>, vector<64x32xbf16>, vector<8x32xf32> -> vector<8x32xf32>
    %119 = vector.broadcast %12 : vector<1x32xf32> to vector<8x32xf32>
    %120 = arith.addf %118, %119 : vector<8x32xf32>
    %121 = arith.addf %47, %120 : vector<8x32xf32>
    %c0_49 = arith.constant 0 : index
    %c0_50 = arith.constant 0 : index
    %122 = vector.load %arg10[%c0_49, %c0_50] : memref<8x32xf32, #tpu.memory_space<vmem>>, vector<8x32xf32>
    tpu.vector_store %arg10[%c0_49, %c0_50], %121 {strides = array<i32>} : memref<8x32xf32, #tpu.memory_space<vmem>>, vector<8x32xf32>,
    %c1_i32 = arith.constant 1 : i32
    %123 = arith.cmpi eq, %arg0, %c1_i32 : i32
    %124 = arith.extui %123 : i1 to i32
    %c0_i32_51 = arith.constant 0 : i32
    %125 = arith.cmpi ne, %124, %c0_i32_51 : i32
    scf.if %125 {
      %c0_52 = arith.constant 0 : index
      %c0_53 = arith.constant 0 : index
      %126 = vector.load %arg2[%c0_52, %c0_53] : memref<8x32xf32, #tpu.memory_space<vmem>>, vector<1x32xf32>
      %c1 = arith.constant 1 : index
      %c0_54 = arith.constant 0 : index
      %127 = vector.load %arg2[%c1, %c0_54] : memref<8x32xf32, #tpu.memory_space<vmem>>, vector<1x32xf32>
      %cst_55 = arith.constant dense<0.000000e+00> : vector<8xf32>
      %128 = vector.multi_reduction <add>, %121, %cst_55 [1] : vector<8x32xf32> to vector<8xf32>
      %129 = vector.shape_cast %128 : vector<8xf32> to vector<8x1xf32>
      %cst_56 = arith.constant 3.200000e+01 : f32
      %130 = vector.broadcast %cst_56 : f32 to vector<8x1xf32>
      %131 = arith.divf %129, %130 : vector<8x1xf32>
      %132 = vector.broadcast %131 : vector<8x1xf32> to vector<8x32xf32>
      %133 = arith.subf %121, %132 : vector<8x32xf32>
      %134 = arith.mulf %133, %133 : vector<8x32xf32>
      %cst_57 = arith.constant dense<0.000000e+00> : vector<8xf32>
      %135 = vector.multi_reduction <add>, %134, %cst_57 [1] : vector<8x32xf32> to vector<8xf32>
      %136 = vector.shape_cast %135 : vector<8xf32> to vector<8x1xf32>
      %cst_58 = arith.constant 3.200000e+01 : f32
      %137 = vector.broadcast %cst_58 : f32 to vector<8x1xf32>
      %138 = arith.divf %136, %137 : vector<8x1xf32>
      %cst_59 = arith.constant 9.99999974E-6 : f32
      %139 = vector.broadcast %cst_59 : f32 to vector<8x1xf32>
      %140 = arith.addf %138, %139 : vector<8x1xf32>
      %141 = math.rsqrt %140 : vector<8x1xf32>
      %142 = vector.broadcast %141 : vector<8x1xf32> to vector<8x32xf32>
      %143 = arith.mulf %133, %142 : vector<8x32xf32>
      %144 = vector.broadcast %126 : vector<1x32xf32> to vector<8x32xf32>
      %145 = arith.mulf %143, %144 : vector<8x32xf32>
      %146 = vector.broadcast %127 : vector<1x32xf32> to vector<8x32xf32>
      %147 = arith.addf %145, %146 : vector<8x32xf32>
      %c0_60 = arith.constant 0 : index
      %c0_61 = arith.constant 0 : index
      %148 = vector.load %arg9[%c0_60, %c0_61] : memref<8x32xf32, #tpu.memory_space<vmem>>, vector<8x32xf32>
      tpu.vector_store %arg9[%c0_60, %c0_61], %147 {strides = array<i32>} : memref<8x32xf32, #tpu.memory_space<vmem>>, vector<8x32xf32>,
    } else {
    }
    return
  }
  func.func @transform_0(%arg0: i32) -> (i32, i32) {
    %c0_i32 = arith.constant 0 : i32
    %c0_i32_0 = arith.constant 0 : i32
    %c0_i32_1 = arith.constant 0 : i32
    return %c0_i32, %c0_i32_0 : i32, i32
  }
  func.func @transform_1(%arg0: i32) -> (i32, i32) {
    %c0_i32 = arith.constant 0 : i32
    %c0_i32_0 = arith.constant 0 : i32
    %c0_i32_1 = arith.constant 0 : i32
    return %c0_i32, %c0_i32_0 : i32, i32
  }
  func.func @transform_2(%arg0: i32) -> (i32, i32, i32) {
    %c0_i32 = arith.constant 0 : i32
    %c0_i32_0 = arith.constant 0 : i32
    %c0_i32_1 = arith.constant 0 : i32
    return %arg0, %c0_i32, %c0_i32_0 : i32, i32, i32
  }
  func.func @transform_3(%arg0: i32) -> (i32, i32, i32) {
    %c0_i32 = arith.constant 0 : i32
    %c0_i32_0 = arith.constant 0 : i32
    %c0_i32_1 = arith.constant 0 : i32
    return %arg0, %c0_i32, %c0_i32_0 : i32, i32, i32
  }
  func.func @transform_4(%arg0: i32) -> (i32, i32, i32) {
    %c0_i32 = arith.constant 0 : i32
    %c0_i32_0 = arith.constant 0 : i32
    %c0_i32_1 = arith.constant 0 : i32
    return %arg0, %c0_i32, %c0_i32_0 : i32, i32, i32
  }
  func.func @transform_5(%arg0: i32) -> (i32, i32, i32) {
    %c0_i32 = arith.constant 0 : i32
    %c0_i32_0 = arith.constant 0 : i32
    %c0_i32_1 = arith.constant 0 : i32
    return %arg0, %c0_i32, %c0_i32_0 : i32, i32, i32
  }
  func.func @transform_6(%arg0: i32) -> (i32, i32, i32) {
    %c0_i32 = arith.constant 0 : i32
    %c0_i32_0 = arith.constant 0 : i32
    %c0_i32_1 = arith.constant 0 : i32
    return %arg0, %c0_i32, %c0_i32_0 : i32, i32, i32
  }
  func.func @transform_7(%arg0: i32) -> (i32, i32, i32) {
    %c0_i32 = arith.constant 0 : i32
    %c0_i32_0 = arith.constant 0 : i32
    %c0_i32_1 = arith.constant 0 : i32
    return %arg0, %c0_i32, %c0_i32_0 : i32, i32, i32
  }
  func.func @transform_8(%arg0: i32) -> (i32, i32) {
    %c0_i32 = arith.constant 0 : i32
    %c0_i32_0 = arith.constant 0 : i32
    %c0_i32_1 = arith.constant 0 : i32
    return %c0_i32, %c0_i32_0 : i32, i32
  }
}

</mosaic_0001>

<bundles_post_ra>
// kernel: tpu_custom_call.1
= control target key start
LH: loop header
LB: loop body
LE: loop exit
PB: predicated region body
PF: predicated region fallthrough
CT: control target
= control target key end

     0   :  { %s1536_s0 = inlined_call_operand.hbm [shape: f32[8,32], index: 0, kind: input, shape index: {}]   ;;  %s1537_s1 = inlined_call_operand.hbm [shape: f32[8,32], index: 1, kind: input, shape index: {}]   ;;  %s1538_s2 = inlined_call_operand.hbm [shape: f32[2,8,32], index: 2, kind: input, shape index: {}]   ;;  %s1539_s3 = inlined_call_operand.hbm [shape: f32[2,1,64], index: 3, kind: input, shape index: {}]   ;;  %s1540_s4 = inlined_call_operand.vmem [shape: bf16[2,32,32], index: 4, kind: input, shape index: {}]   ;;  %s1541_s5 = inlined_call_operand.vmem [shape: bf16[2,32,32], index: 5, kind: input, shape index: {}]   ;;  %s1542_s6 = inlined_call_operand.vmem [shape: bf16[2,32,64], index: 6, kind: input, shape index: {}]   ;;  %s1543_s7 = inlined_call_operand.vmem [shape: bf16[2,64,32], index: 7, kind: input, shape index: {}]   ;;  %s1544_s8 = inlined_call_operand.hbm [shape: f32[8,32], index: 8, kind: output, shape index: {}]  }
   0x1   :  { %1546 = sst [smem:[#allocation15_spill]] %s1536_s0 }
   0x2   :  { %1547 = sst [smem:[#allocation16_spill]] %s1537_s1 }
   0x3   :  { %13 = vsyncpa [#allocation4], 0 }
   0x4   :  { %14 = vsyncpa [#allocation7], 0 }
   0x5   :  { %15 = vsyncpa [#allocation5], 0  ;;  %s1312_s27 = smov 0   ;;  %s1314_s28 = smov 0  }
   0x6   :  { %s1316_s29 = smov 0   ;;  %s1318_s30 = smov 0  }
   0x7 LB: > { %s1331_s9 = sadd.s32 4294967295, %s1260_s30   ;;  %p83_p0 = scmp.ne.s32.totalorder %s1252_s28, %s1248_s27  ;;  %s1260_s30 = sphi %s1318_s30, %s1558_s30   ;;  %s1256_s29 = sphi %s1316_s29, %s1557_s29   ;;  %s1252_s28 = sphi %s1314_s28, %s1556_s28   ;;  %s1248_s27 = sphi %s1312_s27, %s1555_s27  }
   0x8   : > { %p84_p1 = scmp.eq.s32.totalorder %s1331_s9, 0  ;;  %p895_p2 = scmp.ge.s32.totalorder %s1260_s30, 1 }
   0x9   : > { %p245_p3 = scmp.lt.s32.totalorder %s1260_s30, 3  ;;  %p896_p4 = scmp.ne.s32.totalorder %s1331_s9, 0 }
   0xa   : > { %p1340_p5 = por %p84_p1, %p83_p0  ;;  %s1549_s0 = sld [smem:[#allocation15_spill]] }
   0xb   : > { %p1347_p6 = pnand %p895_p2, %p245_p3  ;;  %s1262_s15 = smov [#allocation3]  }
   0xc   : > { %s259_s16 = sshll.u32 %s1262_s15, 4  ;;  %s1360_s18 = sadd.s32 1, %s1260_s30   ;;  %s260_s16 = int_to_ptr.vmem [resolvable:$true] %s259_s16 }
   0xd   : > { %p993_p7 = pneg %p1347_p6  ;;  %s70_s19 = sadd.s32 1, %s1256_s29 }
   0xe   : > { %s67_s20 = ssub.s32 %s1260_s30, %s1360_s18  ;;  %p77_p10 = scmp.ne.s32.totalorder %s1256_s29, %s1252_s28 }
   0xf   : > { %p1355_p8 = pnand %p993_p7, %p84_p1  ;;  %p68_p9 = scmp.eq.s32.totalorder %s67_s20, 0 }
  0x10   : > { %s257_s13 = sshll.u32 %s1549_s0, 4  ;;  %p78_p11 = scmp.eq.s32.totalorder %s1260_s30, 0  ;;  %s258_s13 = int_to_ptr.hbm [resolvable:$true] %s257_s13 }
  0x11   : > { %996 = dma.hbm_to_vmem [thread:$0]  (!%p1355_p8), %s258_s13, 128, %s260_s16, [#allocation4]  }
  0x12   : > { %p1009_p12 = scmp.lt.s32.totalorder %s1260_s30, 2  ;;  %p79_p13 = por %p78_p11, %p77_p10 }
  0x13   : > { %s1372_s21 = scalar_select %p68_p9, %s1256_s29, %s70_s19  }
  0x14   : > { %s282_s22 = sand.u32 1, %s1260_s30   ;;  %s1545_s23 = sand.u32 1, %s1256_s29  }
  0x15   : > { %s899_s24 = sshll.u32 %s1545_s23, 3  ;;  %s900_s25 = sshll.u32 %s1260_s30, 3 }
  0x16   : > { %s290_s11 = scalar_lea.hbm %s1538_s2, %s900_s25  ;;  %s286_s15 = scalar_lea.vmem [#allocation8], %s899_s24 }
  0x17   : > { %s292_s12 = sshll.u32 %s290_s11, 4  ;;  %s294_s13 = sshll.u32 %s286_s15, 4  ;;  %s293_s12 = int_to_ptr.hbm [resolvable:$true] %s292_s12  ;;  %s295_s13 = int_to_ptr.vmem [resolvable:$true] %s294_s13 }
  0x18   : > { %p1384_p0 = pnand %p1009_p12, %p79_p13  ;;  %s1553_s1 = sld [smem:[#allocation16_spill]] }
  0x19   : > { %s1263_s0 = smov [#allocation6]   ;;  %s1391_s25 = scalar_lea.sflag [#allocation4], %s282_s22 }
  0x1a   : > { %s271_s26 = sshll.u32 %s1263_s0, 4  ;;  %s1096_s24 = sshra.s32 %s293_s12, 4  ;;  %s1097_s24 = int_to_ptr.hbm [resolvable:$true] %s1096_s24  ;;  %s272_s26 = int_to_ptr.vmem [resolvable:$true] %s271_s26 }
  0x1b   : > { %s1098_s27 = scalar_lea.hbm %s1097_s24, 8  ;;  %p1100_p3 = pneg %p1384_p0 }
  0x1c   : > { %p1099_p2 = scmp.ne.s32.totalorder %s1097_s24, %s1098_s27  ;;  %s1103_s19 = scalar_lea.hbm %s1538_s2, 16 }
  0x1d   : > { %p1104_p10 = scmp.lt.s32.totalorder %s1097_s24, %s1538_s2  ;;  %p1105_p11 = scmp.lt.s32.totalorder %s1103_s19, %s1098_s27 }
  0x1e   : > { %s269_s23 = sshll.u32 %s1553_s1, 4  ;;  %p1101_p7 = pnand %p1100_p3, %p1099_p2  ;;  %s270_s23 = int_to_ptr.hbm [resolvable:$true] %s269_s23 }
  0x1f   : > { %p1106_p12 = por %p1105_p11, %p1104_p10 }
  0x20   : > { %p1102_p9 = pneg %p1101_p7 }
  0x22   : > { %p1107_p13 = pnand %p1106_p12, %p1102_p9 }
  0x24   : > { %1110 = shalt.err (!%p1107_p13)
}
  0x25   : > { %1003 = dma.hbm_to_vmem [thread:$0]  (!%p1384_p0), %s293_s12, 128, %s295_s13, %s1391_s25  }
  0x26   : > { %999 = dma.hbm_to_vmem [thread:$0]  (!%p1355_p8), %s270_s23, 128, %s272_s26, [#allocation7]  }
  0x27   : > { %s307_s1 = scalar_lea.hbm %s1539_s3, %s1260_s30  ;;  %s1554_s24 = sand.u32 1, %s1256_s29  }
  0x28   : > { %s304_s27 = scalar_lea.vmem [#allocation9], %s1554_s24  ;;  %s309_s15 = sshll.u32 %s307_s1, 4  ;;  %s310_s15 = int_to_ptr.hbm [resolvable:$true] %s309_s15 }
  0x29   : > { %s311_s11 = sshll.u32 %s304_s27, 4  ;;  %s1156_s19 = sshra.s32 %s310_s15, 4  ;;  %s312_s11 = int_to_ptr.vmem [resolvable:$true] %s311_s11  ;;  %s1157_s19 = int_to_ptr.hbm [resolvable:$true] %s1156_s19 }
  0x2a   : > { %s1158_s20 = scalar_lea.hbm %s1157_s19, 1  ;;  %s1163_s12 = scalar_lea.hbm %s1539_s3, 2 }
  0x2b   : > { %p1159_p2 = scmp.ne.s32.totalorder %s1157_s19, %s1158_s20  ;;  %p1164_p8 = scmp.lt.s32.totalorder %s1157_s19, %s1539_s3 }
  0x2c   : > { %p1165_p10 = scmp.lt.s32.totalorder %s1163_s12, %s1158_s20 }
  0x2d   : > { %p1161_p7 = pnand %p1159_p2, %p1100_p3 }
  0x2e   : > { %p1166_p11 = por %p1165_p10, %p1164_p8 }
  0x2f   : > { %p1162_p9 = pneg %p1161_p7 }
  0x31   : > { %p1167_p12 = pnand %p1166_p11, %p1162_p9 }
  0x33   : > { %1170 = shalt.err (!%p1167_p12)
}
  0x34   : > { %1006 = dma.hbm_to_vmem [thread:$0]  (!%p1384_p0), %s310_s15, 16, %s312_s11, %s1391_s25  }
  0x35   : > { %352 = sbr.rel (%p1347_p6) target bundleno = 1485 (0x5cd), region = 52 }
  0x3a   : > { %1231 = dma.done.wait (%p84_p1), [#allocation4], 128  }
  0x3b   : > { %1233 = vsyncadd (%p84_p1), [#allocation4], 4294967168 }
  0x3c   : > { %1235 = dma.done.wait (%p84_p1), [#allocation7], 128  }
  0x3d   : > { %1237 = vsyncadd (%p84_p1), [#allocation7], 4294967168  ;;  %s364_s16 = sand.u32 1, %s1331_s9   ;;  %s366_s26 = sand.u32 1, %s1252_s28  }
  0x3e   : > { %s1439_s25 = sshll.u32 %s366_s26, 3  ;;  %s365_s14 = scalar_lea.sflag [#allocation4], %s364_s16 }
  0x3f   : > { %s368_s0 = scalar_lea.vmem [#allocation8], %s1439_s25 }
  0x40   : > { %1239 = dma.done.wait (%p1340_p5), %s365_s14, 144  }
  0x41   : > { %1241 = vsyncadd (%p1340_p5), %s365_s14, 4294967152  ;;  %p430_p6 = scmp.lt.s32.totalorder %s1331_s9, 1  ;;  %s1468_s14 = scalar_lea.vmem [#allocation9], %s366_s26 }
  0x43   : > { %s431_s22 = scalar_select %p430_p6, %s1331_s9, 1 }
  0x44   : > { %454 = sbr.rel (%p896_p4) target bundleno = 75 (0x4b), region = 72 }
  0x45   : > { %s963_s1 = sshll.u32 %s431_s22, 4  ;;  %s966_s24 = sshll.u32 %s431_s22, 5 }
  0x46   : > { %s1451_s15 = scalar_lea.vmem %s1540_s4, %s963_s1  ;;  %s1456_s17 = scalar_lea.vmem %s1541_s5, %s963_s1 }
  0x47   : > { %s1461_s10 = scalar_lea.vmem %s1542_s6, %s963_s1  ;;  %s1466_s16 = scalar_lea.vmem %s1543_s7, %s966_s24 }
  0x49   : > { %v455_v0 = vld [vmem:[#allocation3] sm:$0xff]  ;;  %vm456_vm0 = vcmask 261120  }
  0x4a   : > { %457 = vst.msk [vmem:[#allocation2] sm:$0xff] %vm456_vm0, %v455_v0 }
  0x4b PF: > { %vm461_vm1 = vcmask 261120   ;;  %v1264_v3 = vmov 32.0   ;;  %v968_v15 = vld [vmem:[%s1451_s15 + $0x8] sm:$0xff]  ;;  %v967_v16 = vld [vmem:[%s1451_s15] sm:$0xff]  ;;  %vm700_vm14 = vcmask 523264   ;;  %p958_p1 = scmp.ne.s32.totalorder %s1331_s9, 1 }
  0x4c   : > { %1052 = vrcp.f32 %v1264_v3  ;;  %522 = vmatpush.bf16.msra.mxu0 %v968_v15  ;;  %v970_v17 = vld [vmem:[%s1456_s17 + $0x8] sm:$0xff]  ;;  %v1483_v26 = vld [vmem:[%s368_s0] sm:$0xff] }
  0x4d   : > { %556 = vmatpush.bf16.msra.mxu1 %v970_v17  ;;  %v491_v28 = vperm.slane %v1483_v26, 0  ;;  %v493_v31 = vperm.slane %v1483_v26, 1  ;;  %v969_v35 = vld [vmem:[%s1456_s17] sm:$0xff]  ;;  %v500_v36 = vperm.slane %v1483_v26, 2  ;;  %v534_v41 = vperm.slane %v1483_v26, 3  ;;  %v972_v52 = vld [vmem:[%s1461_s10 + $0x8] sm:$0xff] }
  0x4e   : > { %619 = vmatpush.bf16.msra.mxu2 %v972_v52  ;;  %v971_v53 = vld [vmem:[%s1461_s10] sm:$0xff]  ;;  %v586_v63 = vperm.slane %v1483_v26, 4  ;;  %v976_v15 = vld [vmem:[%s1466_s16 + $0x18] sm:$0xff] }
  0x4f   : > { %708 = vmatpush.bf16.msra.mxu3 %v976_v15 }
  0x50   : > { %523 = vmatpush.bf16.msra.mxu0 %v967_v16  ;;  %v975_v16 = vld [vmem:[%s1466_s16 + $0x10] sm:$0xff] }
  0x51   : > { %v458_v1 = vld [vmem:[#allocation2] sm:$0xff]  ;;  %557 = vmatpush.bf16.msra.mxu1 %v969_v35 }
  0x52   : > { %v462_v2 = vsel %vm461_vm1, %v458_v1, 0.0  ;;  %v1053_v4 = vpop.eup %1052  ;;  %620 = vmatpush.bf16.msra.mxu2 %v971_v53  ;;  %v675_v53 = vperm.slane %v1483_v26, 6 }
  0x53   : > { %463 = vadd.xlane.f32.xlu0 %v462_v2  ;;  %v466_v5 = vmul.f32 32.0, %v1053_v4  ;;  %vm470_vm2 = vweird.f32 %v1053_v4  ;;  %v588_v2 = vperm.slane %v1483_v26, 5  ;;  %709 = vmatpush.bf16.msra.mxu3 %v975_v16 }
  0x55   : > { %v467_v6 = vsub.f32 1.0, %v466_v5 }
  0x57   : > { %v468_v7 = vmul.f32 %v1053_v4, %v467_v6  ;;  %v1051_v6 = vld [vmem:[%s1468_s14] ss:$0 sm:$0xff] }
  0x59   : > { %v469_v8 = vadd.f32 %v1053_v4, %v468_v7 }
  0x5b   : > { %v1473_v9 = vsel %vm470_vm2, %v1053_v4, %v469_v8 }
  0xc6   : > { %v464_v10 = vpop.xlane.xlu0 %463 }
  0xc7   : > { %v472_v11 = vmul.f32 %v1473_v9, %v464_v10 }
  0xc9   : > { %v473_v12 = vsub.f32 %v458_v1, %v472_v11 }
  0xcb   : > { %v474_v13 = vmul.f32 %v473_v12, %v473_v12 }
  0xcd   : > { %v475_v14 = vsel %vm461_vm1, %v474_v13, 0.0 }
  0xce   : > { %476 = vadd.xlane.f32.xlu0 %v475_v14 }
 0x141   : > { %v477_v18 = vpop.xlane.xlu0 %476 }
 0x142   : > { %v478_v19 = vmul.f32 %v477_v18, %v1473_v9 }
 0x144   : > { %v479_v20 = vadd.f32 1e-05, %v478_v19  ;;  %v974_v19 = vld [vmem:[%s1466_s16 + $0x8] sm:$0xff] }
 0x145   : > { %710 = vmatpush.bf16.msra.mxu3 %v974_v19 }
 0x146   : > { %1054 = vrsqrt.f32 %v479_v20  ;;  %vm486_vm4 = vweird.f32 %v479_v20 }
 0x14c   : > { %v1055_v21 = vpop.eup %1054 }
 0x14d   : > { %v481_v22 = vmul.f32 %v1055_v21, %v479_v20  ;;  %vm487_vm3 = vweird.f32 %v1055_v21 }
 0x14e   : > { %vm488_vm5 = vmor %vm486_vm4, %vm487_vm3 }
 0x14f   : > { %v482_v23 = vmul.f32 %v1055_v21, %v481_v22 }
 0x151   : > { %v483_v24 = vmul.f32 0.5, %v482_v23 }
 0x153   : > { %v484_v25 = vsub.f32 1.5, %v483_v24 }
 0x155   : > { %v485_v27 = vmul.f32 %v1055_v21, %v484_v25 }
 0x157   : > { %v489_v29 = vsel %vm488_vm5, %v1055_v21, %v485_v27  ;;  %v973_v21 = vld [vmem:[%s1466_s16] sm:$0xff] }
 0x158   : > { %v490_v30 = vmul.f32 %v489_v29, %v473_v12  ;;  %711 = vmatpush.bf16.msra.mxu3 %v973_v21 }
 0x15a   : > { %v492_v32 = vmul.f32 %v491_v28, %v490_v30 }
 0x15c   : > { %v494_v33 = vadd.f32 %v493_v31, %v492_v32 }
 0x15e   : > { %v495_v34 = vpack.c.bf16 %v494_v33, %v494_v33 }
 0x160   : > { %922 = vmatmul.msk.bf16.vlgmr.msra.gmra.mxu0 %vm461_vm1, %v495_v34 }
 0x1dd   : > { %v525_v37 = vpop.f32.mrf.mxu0 }
 0x1de   : > { %v526_v38 = vadd.f32 %v525_v37, %v500_v36 }
 0x1e0   : > { %v529_v39 = vpack.c.bf16 %v526_v38, %v526_v38 }
 0x1e2   : > { %931 = vmatmul.msk.bf16.vlgmr.msra.gmra.mxu1 %vm461_vm1, %v529_v39 }
 0x1e5   : > { %v527_v40 = vpop.f32.mrf.mxu0 }
 0x25f   : > { %v559_v42 = vpop.f32.mrf.mxu1 }
 0x260   : > { %v560_v43 = vadd.f32 %v559_v42, %v534_v41 }
 0x262   : > { %v1492_v44 = vadd.f32 %v560_v43, %v458_v1 }
 0x264   : > { %v564_v45 = vsel %vm461_vm1, %v1492_v44, 0.0 }
 0x265   : > { %565 = vadd.xlane.f32.xlu1 %v564_v45 }
 0x267   : > { %v561_v46 = vpop.f32.mrf.mxu1 }
 0x268   : > { %v1265_v46 = vmov -1.0  }
 0x2d8   : > { %v566_v47 = vpop.xlane.xlu1 %565 }
 0x2d9   : > { %v567_v48 = vmul.f32 %v566_v47, %v1473_v9 }
 0x2db   : > { %v568_v49 = vsub.f32 %v1492_v44, %v567_v48 }
 0x2dd   : > { %v569_v50 = vmul.f32 %v568_v49, %v568_v49 }
 0x2df   : > { %v570_v51 = vsel %vm461_vm1, %v569_v50, 0.0 }
 0x2e0   : > { %571 = vadd.xlane.f32.xlu1 %v570_v51 }
 0x353   : > { %v572_v54 = vpop.xlane.xlu1 %571 }
 0x354   : > { %v573_v55 = vmul.f32 %v572_v54, %v1473_v9 }
 0x356   : > { %v574_v56 = vadd.f32 1e-05, %v573_v55 }
 0x358   : > { %1056 = vrsqrt.f32 %v574_v56  ;;  %vm581_vm7 = vweird.f32 %v574_v56 }
 0x35e   : > { %v1057_v57 = vpop.eup %1056 }
 0x35f   : > { %v576_v58 = vmul.f32 %v1057_v57, %v574_v56  ;;  %vm582_vm6 = vweird.f32 %v1057_v57 }
 0x360   : > { %vm583_vm8 = vmor %vm581_vm7, %vm582_vm6 }
 0x361   : > { %v577_v59 = vmul.f32 %v1057_v57, %v576_v58 }
 0x363   : > { %v578_v60 = vmul.f32 0.5, %v577_v59 }
 0x365   : > { %v579_v61 = vsub.f32 1.5, %v578_v60 }
 0x367   : > { %v580_v62 = vmul.f32 %v1057_v57, %v579_v61 }
 0x369   : > { %v584_v0 = vsel %vm583_vm8, %v1057_v57, %v580_v62 }
 0x36a   : > { %v585_v1 = vmul.f32 %v584_v0, %v568_v49 }
 0x36c   : > { %v587_v3 = vmul.f32 %v586_v63, %v585_v1 }
 0x36e   : > { %v589_v4 = vadd.f32 %v588_v2, %v587_v3 }
 0x370   : > { %v590_v5 = vpack.c.bf16 %v589_v4, %v589_v4 }
 0x372   : > { %940 = vmatmul.msk.bf16.vlgmr.msra.gmra.mxu2 %vm461_vm1, %v590_v5 }
 0x3f5   : > { %v622_v7 = vpop.f32.mrf.mxu2 }
 0x3f6   : > { %v623_v8 = vadd.f32 %v1051_v6, %v622_v7 }
 0x3f8   : > { %v627_v10 = vmul.f32 0.70710677, %v623_v8  ;;  %v626_v49 = vmul.f32 0.5, %v623_v8 }
 0x3fa   : > { %v630_v11 = vand.u32 2147483647, %v627_v10  ;;  %vm628_vm13 = vcmp.ge.f32.partialorder %v627_v10, 0.0 }
 0x3fb   : > { %v629_v47 = vsel %vm628_vm13, 1.0, %v1265_v46 }
 0x3fc   : > { %v631_v12 = vmul.f32 0.3275911, %v630_v11  ;;  %v657_v30 = vsub.f32 0.0, %v630_v11 }
 0x3fd   : > { %v624_v13 = vpop.f32.mrf.mxu2 }
 0x3fe   : > { %v632_v14 = vadd.f32 1.0, %v631_v12  ;;  %v658_v33 = vmul.f32 %v657_v30, %v630_v11 }
 0x400   : > { %1058 = vrcp.f32 %v632_v14  ;;  %v644_v22 = vand.u32 2147483648, %v632_v14  ;;  %v642_v24 = vand.u32 2147483647, %v632_v14  ;;  %vm638_vm10 = vweird.f32 %v632_v14 }
 0x401   : > { %v659_v36 = vmul.f32 1.442695, %v658_v33 }
 0x402   : > { %v645_v27 = vor.u32 1.1754944e-38, %v644_v22  ;;  %vm643_vm12 = vcmp.eq.f32.partialorder %v642_v24, 8.507059e+37 }
 0x403   : > { %1060 = vpow2.f32 %v659_v36 }
 0x406   : > { %v1059_v17 = vpop.eup %1058 }
 0x407   : > { %v634_v18 = vmul.f32 %v1059_v17, %v632_v14  ;;  %vm639_vm9 = vweird.f32 %v1059_v17 }
 0x408   : > { %vm640_vm11 = vmor %vm638_vm10, %vm639_vm9 }
 0x409   : > { %v635_v20 = vsub.f32 1.0, %v634_v18  ;;  %v1061_v42 = vpop.eup %1060 }
 0x40b   : > { %v636_v23 = vmul.f32 %v1059_v17, %v635_v20 }
 0x40d   : > { %v637_v25 = vadd.f32 %v1059_v17, %v636_v23 }
 0x40f   : > { %v641_v28 = vsel %vm640_vm11, %v1059_v17, %v637_v25 }
 0x410   : > { %v646_v29 = vsel %vm643_vm12, %v645_v27, %v641_v28 }
 0x411   : > { %v648_v31 = vmul.f32 1.0614054, %v646_v29 }
 0x413   : > { %v649_v32 = vadd.f32 -1.4531521, %v648_v31 }
 0x415   : > { %v650_v34 = vmul.f32 %v649_v32, %v646_v29 }
 0x417   : > { %v651_v35 = vadd.f32 1.4214138, %v650_v34 }
 0x419   : > { %v652_v37 = vmul.f32 %v651_v35, %v646_v29 }
 0x41b   : > { %v653_v38 = vadd.f32 -0.28449672, %v652_v37 }
 0x41d   : > { %v654_v39 = vmul.f32 %v653_v38, %v646_v29 }
 0x41f   : > { %v655_v40 = vadd.f32 0.2548296, %v654_v39 }
 0x421   : > { %v656_v41 = vmul.f32 %v655_v40, %v646_v29 }
 0x423   : > { %v661_v43 = vmul.f32 %v1061_v42, %v656_v41 }
 0x425   : > { %v662_v45 = vsub.f32 1.0, %v661_v43 }
 0x427   : > { %v663_v48 = vmul.f32 %v662_v45, %v629_v47 }
 0x429   : > { %v664_v50 = vadd.f32 1.0, %v663_v48 }
 0x42b   : > { %v665_v51 = vmul.f32 %v664_v50, %v626_v49 }
 0x42d   : > { %v666_v52 = vpack.c.bf16 %v665_v51, %v665_v51 }
 0x42f   : > { %957 = vmatmul.msk.bf16.vlgmr.msra.gmra.mxu3 %vm700_vm14, %v666_v52 }
 0x4b2   : > { %v713_v54 = vpop.f32.mrf.mxu3 }
 0x4b3   : > { %v714_v55 = vadd.f32 %v713_v54, %v675_v53 }
 0x4b5   : > { %v717_v56 = vadd.f32 %v714_v55, %v1492_v44 }
 0x4b6   : > { %722 = sbr.rel (%p958_p1) target bundleno = 1480 (0x5c8), region = 76 }
 0x4b7   : > { %718 = vst.msk [vmem:[#allocation2] sm:$0xff] %vm461_vm1, %v717_v56 }
 0x4ba   : > { %v715_v57 = vpop.f32.mrf.mxu3 }
 0x4bb   : > { %v725_v58 = vsel %vm461_vm1, %v717_v56, 0.0  ;;  %v1062_v7 = vld [vmem:[#allocation6] ss:$0 sm:$0xff]  ;;  %v1063_v11 = vld [vmem:[#allocation6 + $0x1] ss:$0 sm:$0xff] }
 0x4bc   : > { %726 = vadd.xlane.f32.xlu0 %v725_v58 }
 0x52f   : > { %v727_v59 = vpop.xlane.xlu0 %726 }
 0x530   : > { %v728_v60 = vmul.f32 %v727_v59, %v1473_v9 }
 0x532   : > { %v729_v61 = vsub.f32 %v717_v56, %v728_v60 }
 0x534   : > { %v730_v62 = vmul.f32 %v729_v61, %v729_v61 }
 0x536   : > { %v731_v26 = vsel %vm461_vm1, %v730_v62, 0.0 }
 0x537   : > { %732 = vadd.xlane.f32.xlu0 %v731_v26 }
 0x5aa   : > { %v733_v63 = vpop.xlane.xlu0 %732 }
 0x5ab   : > { %v734_v44 = vmul.f32 %v733_v63, %v1473_v9 }
 0x5ad   : > { %v735_v0 = vadd.f32 1e-05, %v734_v44 }
 0x5af   : > { %1064 = vrsqrt.f32 %v735_v0  ;;  %vm742_vm0 = vweird.f32 %v735_v0 }
 0x5b5   : > { %v1065_v1 = vpop.eup %1064 }
 0x5b6   : > { %v737_v2 = vmul.f32 %v1065_v1, %v735_v0  ;;  %vm743_vm15 = vweird.f32 %v1065_v1 }
 0x5b7   : > { %vm744_vm2 = vmor %vm742_vm0, %vm743_vm15 }
 0x5b8   : > { %v738_v3 = vmul.f32 %v1065_v1, %v737_v2 }
 0x5ba   : > { %v739_v4 = vmul.f32 0.5, %v738_v3 }
 0x5bc   : > { %v740_v5 = vsub.f32 1.5, %v739_v4 }
 0x5be   : > { %v741_v6 = vmul.f32 %v1065_v1, %v740_v5 }
 0x5c0   : > { %v745_v8 = vsel %vm744_vm2, %v1065_v1, %v741_v6 }
 0x5c1   : > { %v746_v10 = vmul.f32 %v745_v8, %v729_v61 }
 0x5c3   : > { %v748_v12 = vmul.f32 %v1062_v7, %v746_v10 }
 0x5c5   : > { %v750_v13 = vadd.f32 %v1063_v11, %v748_v12 }
 0x5c7   : > { %751 = vst.msk [vmem:[#allocation10] sm:$0xff] %vm461_vm1, %v750_v13 }
 0x5c8 PF: > { %p1012_p4 = scmp.eq.s32.totalorder %s1331_s9, 1  ;;  %s1266_s26 = smov [#allocation10]  }
 0x5c9   : > { %s758_s25 = sshll.u32 %s1266_s26, 4  ;;  %s760_s1 = sshll.u32 %s1544_s8, 4  ;;  %s759_s25 = int_to_ptr.vmem [resolvable:$true] %s758_s25  ;;  %s761_s1 = int_to_ptr.hbm [resolvable:$true] %s760_s1 }
 0x5ca   : > { %990 = dma.vmem_to_hbm [thread:$0]  (%p1012_p4), %s759_s25, 128, %s761_s1, [#allocation5]  }
 0x5cb   : > { %1243 = dma.done.wait (%p1012_p4), [#allocation5], 128  }
 0x5cc   : > { %1245 = vsyncadd (%p1012_p4), [#allocation5], 4294967168 }
 0x5cd PF: > { %p18_p5 = scmp.ge.s32.totalorder %s1360_s18, 4   ;;  %s1555_s27 = smov %s1252_s28 }
 0x5ce   : > { %s1556_s28 = smov %s1256_s29  ;;  %s1557_s29 = smov %s1372_s21 }
 0x5cf   : > { %s1558_s30 = smov %s1360_s18  ;;  %20 = sbr.rel (!%p18_p5) target bundleno = 7 (0x7), region = 127 }
 0x5d4   :  { %774 = vsyncpa [#allocation4], 1 }
 0x5d5   :  { %776 = vsyncpa [#allocation4 + $0x1], 1 }
 0x5d6   :  { %777 = vsyncpa [#allocation7], 1 }
 0x5d7   :  { %778 = vsyncpa [#allocation5], 1 }
 0x5d8   :  { %780 = vsyncpa [#allocation5 + $0x1], 1 }

</bundles_post_ra>
